<compile_context>
chip_gen: v7x
topology: tpu7x:2x2x1
jax: 0.10.0
libtpu: 0.0.40
codegen_flags: <defaults>
</compile_context>

<pallas_src>
import functools

import jax
import jax.numpy as jnp
from jax.experimental import pallas as pl
from jax.experimental.pallas import tpu as pltpu


def _round_up(x, m):
    return ((x + m - 1) // m) * m


def _vmem_cap_bytes():
    """Generation-aware VMEM budget: physical capacity minus compiler headroom."""
    try:
        cap = int(pltpu.get_tpu_info().vmem_capacity_bytes)
    except Exception:
        cap = 64 * 1024 * 1024          # conservative fallback (v7x per-TC)
    if cap <= 64 * 1024 * 1024:         # v7x: leave room for internal scratch
        return cap - 12 * 1024 * 1024
    # v5e / v6e: 128 MiB physical; use most of it but keep headroom.
    return min(cap - 16 * 1024 * 1024, 112 * 1024 * 1024)


def _make_fused_kernel(num_layers):
    """Kernel body for a fixed (static) number of fused layers."""

    def kernel(win_ref, *refs):
        # refs = (w0, b0, w1, b1, ..., w_{L-1}, b_{L-1}, out_ref)
        wb_refs = refs[: 2 * num_layers]
        out_ref = refs[2 * num_layers]

        w0 = wb_refs[0][...]                       # (din, N0) pre-transposed
        h = jnp.dot(win_ref[...], w0, preferred_element_type=jnp.float32)
        h = h + wb_refs[1][...]                    # bias in f32
        for i in range(1, num_layers):
            h = jnp.maximum(h, 0.0)                # ReLU before every layer but the first
            w = wb_refs[2 * i][...]                # (N_{i-1}, N_i), pre-transposed
            h = jnp.dot(h.astype(w.dtype), w, preferred_element_type=jnp.float32)
            h = h + wb_refs[2 * i + 1][...]
        out_ref[...] = h.astype(out_ref.dtype)     # (TM, P_pad) lane-dense store

    return kernel


def pack_cmlp_params(params, compute_dtype=jnp.bfloat16, lane=128):
    """Fuse per-network parameters into wide / block-diagonal matrices.

    Every fused output width is zero-padded to a multiple of `lane` so all
    activations and the final store are lane-dense; the zero columns / rows
    are mathematically inert (ReLU(0)=0, zero weights contribute nothing).

    params: list of (W_i, b_i) with W_i: (p, d_out, d_in), b_i: (p, 1, d_out).
    Returns list of (W_fused, b_fused) with W_fused: (D_in_pad, D_out_pad)
    ready for `h @ W_fused` (no transpose in the kernel); biases stay float32.
    """
    assert len(params) >= 2, "cMLP has at least one hidden layer + head"
    p = params[0][0].shape[0]
    L = len(params)
    fused = []

    # Layer 0: every network reads the full (p*lag) window -> stack outputs.
    W0, b0 = params[0]                                             # (p, h0, p*lag)
    h0, din = W0.shape[1], W0.shape[2]
    n0 = p * h0
    n0_pad = _round_up(n0, lane)
    W0f = jnp.transpose(W0, (2, 0, 1)).reshape(din, n0)            # [d, n*h0+j] = W0[n,j,d]
    W0f = jnp.pad(W0f, ((0, 0), (0, n0_pad - n0)))
    b0f = jnp.pad(b0.reshape(1, n0), ((0, 0), (0, n0_pad - n0)))
    fused.append((W0f.astype(compute_dtype), b0f.astype(jnp.float32)))
    prev_n, prev_n_pad = n0, n0_pad

    # Middle 1x1-conv layers: per-network independent -> block-diagonal.
    for li in range(1, L - 1):
        W, b = params[li]                                          # (p, d_out, d_in)
        d_out, d_in = W.shape[1], W.shape[2]
        blocks = jnp.transpose(W, (0, 2, 1))                       # (p, d_in, d_out) = W[n].T
        eye = jnp.eye(p, dtype=W.dtype)
        bd = (eye[:, None, :, None] * blocks[:, :, None, :]).reshape(p * d_in, p * d_out)
        n = p * d_out
        n_pad = _round_up(n, lane)
        bd = jnp.pad(bd, ((0, prev_n_pad - prev_n), (0, n_pad - n)))
        bf = jnp.pad(b.reshape(1, n), ((0, 0), (0, n_pad - n)))
        fused.append((bd.astype(compute_dtype), bf.astype(jnp.float32)))
        prev_n, prev_n_pad = n, n_pad

    # Head: p scalar outputs fold into a single (p*h_last, P_pad) matrix.
    Wl, bl = params[L - 1]                                         # (p, 1, d_in), (p, 1, 1)
    d_in = Wl.shape[2]
    wl = Wl[:, 0, :]                                               # (p, d_in)
    eye = jnp.eye(p, dtype=Wl.dtype)
    head = (eye[:, None, :] * wl[:, :, None]).reshape(p * d_in, p)
    p_pad = _round_up(p, lane)
    head = jnp.pad(head, ((0, prev_n_pad - prev_n), (0, p_pad - p)))
    bh = jnp.pad(bl.reshape(1, p), ((0, 0), (0, p_pad - p)))
    fused.append((head.astype(compute_dtype), bh.astype(jnp.float32)))
    return fused


def cmlp_forward(X, params, lag, *, tm=1024, use_bf16=True):
    """Pallas forward for cMLP.

    Args:
      X: (batch, T, p) float32.
      params: list of (W_i, b_i) with W_i: (p, d_out, d_in), b_i: (p, 1, d_out).
      lag: conv kernel size of the first layer.
      tm: target M-tile size for large problems (multiple of 128 recommended).
      use_bf16: bf16 matmul inputs (MXU-native on all generations); f32 accumulate.

    Returns:
      (batch, T - lag + 1, p) float32.
    """
    batch, T, p = X.shape
    T_out = T - lag + 1
    M = batch * T_out
    din = p * lag
    compute_dtype = jnp.bfloat16 if use_bf16 else jnp.float32
    itemsize = jnp.dtype(compute_dtype).itemsize

    # --- glue: sliding lag-windows, flattened (channel, lag) to match Conv1d ---
    # TODO(synk): build the lag window inside the kernel from a (TM+lag-1, p)
    # slab (overlapping blocks / manual DMA) to cut input HBM traffic ~lag x.
    idx = jnp.arange(T_out)[:, None] + jnp.arange(lag)[None, :]    # (T_out, lag)
    win = X[:, idx, :]                                             # (batch, T_out, lag, p)
    win = jnp.transpose(win, (0, 1, 3, 2)).reshape(M, din)         # (M, p*lag)

    # --- M tiling ---
    # bf16 packs 2 rows per sublane -> TM multiple of 16; f32 -> multiple of 8.
    row_align = 16 if use_bf16 else 8
    if M >= 2 * tm:
        TM = tm
    elif M > row_align:
        # Split into (at least) two tiles so the "parallel" M axis can shard
        # across both v7x TensorCores even for small/medium M.
        TM = _round_up(-(-M // 2), row_align)
    else:
        TM = row_align
    M_pad = _round_up(M, TM)
    if M_pad != M:
        win = jnp.pad(win, ((0, M_pad - M), (0, 0)))
    win = win.astype(compute_dtype)

    fused = pack_cmlp_params(params, compute_dtype)
    num_layers = len(fused)
    P_out = fused[-1][0].shape[1]                                  # round_up(p, 128)
    kernel = _make_fused_kernel(num_layers)

    in_specs = [pl.BlockSpec((TM, din), lambda m: (m, 0))]
    flat_args = [win]
    for (W, b) in fused:
        # Constant block index -> DMA'd once, stays resident across grid steps.
        in_specs.append(pl.BlockSpec(W.shape, lambda m: (0, 0)))
        in_specs.append(pl.BlockSpec(b.shape, lambda m: (0, 0)))
        flat_args.append(W)
        flat_args.append(b)

    # --- VMEM budget from the actual tile footprint, generation-aware cap ---
    w_bytes = sum(int(W.size) * W.dtype.itemsize + int(b.size) * b.dtype.itemsize
                  for W, b in fused)
    max_width = max([din] + [int(W.shape[1]) for W, _ in fused])
    footprint = (2 * TM * din * itemsize          # window tile, double-buffered
                 + 2 * TM * P_out * 4             # output tile, double-buffered
                 + 2 * w_bytes                    # resident fused weights/biases
                 + 4 * TM * max_width * 4)        # activation headroom (f32)
    cap = _vmem_cap_bytes()
    if footprint > cap:
        raise ValueError(
            f"cMLP fused kernel footprint {footprint/2**20:.1f} MiB exceeds the "
            f"VMEM budget {cap/2**20:.1f} MiB; reduce tm or group the series "
            f"dimension (block-diagonal weights scale as O((p*h)^2)).")
    vmem_limit = int(min(max(2 * footprint, 16 * 1024 * 1024), cap))

    # --- advisory cost estimate for the XLA scheduler ---
    flops = 2 * M_pad * sum(int(W.shape[0]) * int(W.shape[1]) for W, _ in fused)
    bytes_accessed = int(win.size) * itemsize + w_bytes + M_pad * P_out * 4
    cost = pl.CostEstimate(flops=int(flops), transcendentals=0,
                           bytes_accessed=int(bytes_accessed))

    out = pl.pallas_call(
        kernel,
        out_shape=jax.ShapeDtypeStruct((M_pad, P_out), jnp.float32),
        grid=(M_pad // TM,),
        in_specs=in_specs,
        out_specs=pl.BlockSpec((TM, P_out), lambda m: (m, 0)),
        compiler_params=pltpu.CompilerParams(
            dimension_semantics=("parallel",),
            vmem_limit_bytes=vmem_limit),
        cost_estimate=cost,
    )(*flat_args)

    # Lane-dense (M_pad, P_out) -> slice real rows/columns, reshape. No transpose.
    return out[:M, :p].reshape(batch, T_out, p)


def init_cmlp_params(key, num_series, lag, hidden):
    """Deterministic stacked parameters, one MLP per series.

    Layer 0: Conv1d(num_series, hidden[0], lag) -> W flattened to (hidden[0], p*lag)
    Layer i: Conv1d(d_in, d_out, 1)             -> W (d_out, d_in)
    Returns list of (W_all, b_all) stacked over the p networks.
    """
    dims_in = [num_series * lag] + list(hidden)
    dims_out = list(hidden) + [1]
    params = []
    for d_in, d_out in zip(dims_in, dims_out):
        key, kw, kb = jax.random.split(key, 3)
        scale = 1.0 / jnp.sqrt(jnp.float32(d_in))
        W = jax.random.normal(kw, (num_series, d_out, d_in), jnp.float32) * scale
        b = jax.random.normal(kb, (num_series, 1, d_out), jnp.float32) * 0.1
        params.append((W, b))
    return params


def cmlp_reference(X, params, lag):
    """Pure-JAX reference mirroring the PyTorch forward (for validation)."""
    batch, T, p = X.shape
    T_out = T - lag + 1
    idx = jnp.arange(T_out)[:, None] + jnp.arange(lag)[None, :]
    win = X[:, idx, :]
    win = jnp.transpose(win, (0, 1, 3, 2)).reshape(batch * T_out, p * lag)

    cols = []
    for n in range(p):
        h = win
        for i, (W, b) in enumerate(params):
            if i != 0:
                h = jnp.maximum(h, 0.0)
            h = h @ W[n].T + b[n]
        cols.append(h)  # (M, 1)
    out = jnp.concatenate(cols, axis=1)  # (M, p)
    return out.reshape(batch, T_out, p)


if __name__ == "__main__":
    # Small shapes consistent with the module: X is (batch, T, p)
    batch, T, p = 2, 8, 4
    lag = 3
    hidden = [32, 32]

    key = jax.random.PRNGKey(0)
    kx, kp = jax.random.split(key)
    X = jax.random.normal(kx, (batch, T, p), jnp.float32)
    params = init_cmlp_params(kp, p, lag, hidden)

    ref = cmlp_reference(X, params, lag)

    # f32 compute path: must match the f32 reference tightly.
    fwd_f32 = jax.jit(functools.partial(cmlp_forward, lag=lag, use_bf16=False))
    out_f32 = fwd_f32(X, params)
    jax.block_until_ready(out_f32)
    assert out_f32.shape == (batch, T - lag + 1, p), out_f32.shape
    assert jnp.allclose(out_f32, ref, atol=1e-4, rtol=1e-4), "f32 path mismatch vs reference"

    # bf16 compute path (the default, MXU-native): looser tolerance.
    fwd_bf16 = jax.jit(functools.partial(cmlp_forward, lag=lag))
    out_bf16 = fwd_bf16(X, params)
    jax.block_until_ready(out_bf16)
    assert out_bf16.shape == (batch, T - lag + 1, p), out_bf16.shape
    assert jnp.allclose(out_bf16, ref, atol=5e-2, rtol=5e-2), "bf16 path mismatch vs reference"

    print("KERNEL_OK")
</pallas_src>

<mosaic_0001>
module attributes {stable_mosaic.version = 11 : i64} {
  func.func @kernel(%arg0: i32, %arg1: memref<8x12xf32, #tpu.memory_space<vmem>>, %arg2: memref<12x128xf32, #tpu.memory_space<vmem>>, %arg3: memref<1x128xf32, #tpu.memory_space<vmem>>, %arg4: memref<128x128xf32, #tpu.memory_space<vmem>>, %arg5: memref<1x128xf32, #tpu.memory_space<vmem>>, %arg6: memref<128x128xf32, #tpu.memory_space<vmem>>, %arg7: memref<1x128xf32, #tpu.memory_space<vmem>>, %arg8: memref<8x128xf32, #tpu.memory_space<vmem>>) attributes {dimension_semantics = [#tpu.dimension_semantics<parallel>], iteration_bounds = array<i64: 2>, scalar_prefetch = 0 : i64, scratch_operands = 0 : i64, tpu.core_type = #tpu.core_type<tc>, window_params = [{transform_indices = @transform_0, window_bounds = array<i64: 8, 12>}, {pipeline_mode = #tpu.pipeline_mode<synchronous>, transform_indices = @transform_1, window_bounds = array<i64: 12, 128>}, {pipeline_mode = #tpu.pipeline_mode<synchronous>, transform_indices = @transform_2, window_bounds = array<i64: 1, 128>}, {pipeline_mode = #tpu.pipeline_mode<synchronous>, transform_indices = @transform_3, window_bounds = array<i64: 128, 128>}, {pipeline_mode = #tpu.pipeline_mode<synchronous>, transform_indices = @transform_4, window_bounds = array<i64: 1, 128>}, {pipeline_mode = #tpu.pipeline_mode<synchronous>, transform_indices = @transform_5, window_bounds = array<i64: 128, 128>}, {pipeline_mode = #tpu.pipeline_mode<synchronous>, transform_indices = @transform_6, window_bounds = array<i64: 1, 128>}, {transform_indices = @transform_7, window_bounds = array<i64: 8, 128>}]} {
    %c0 = arith.constant 0 : index
    %c0_0 = arith.constant 0 : index
    %0 = vector.load %arg2[%c0, %c0_0] : memref<12x128xf32, #tpu.memory_space<vmem>>, vector<12x128xf32>
    %c0_1 = arith.constant 0 : index
    %c0_2 = arith.constant 0 : index
    %1 = vector.load %arg1[%c0_1, %c0_2] : memref<8x12xf32, #tpu.memory_space<vmem>>, vector<8x12xf32>
    %cst = arith.constant dense<0.000000e+00> : vector<8x128xf32>
    %2 = tpu.matmul %1, %0, %cst {dimension_numbers = #tpu.dot_dimension_numbers<[1], [0], [0], [1], [0, 0, 1, 1], [], []>} : vector<8x12xf32>, vector<12x128xf32>, vector<8x128xf32> -> vector<8x128xf32>
    %c0_3 = arith.constant 0 : index
    %c0_4 = arith.constant 0 : index
    %3 = vector.load %arg3[%c0_3, %c0_4] : memref<1x128xf32, #tpu.memory_space<vmem>>, vector<1x128xf32>
    %4 = vector.broadcast %3 : vector<1x128xf32> to vector<8x128xf32>
    %5 = arith.addf %2, %4 : vector<8x128xf32>
    %cst_5 = arith.constant 0.000000e+00 : f32
    %6 = vector.broadcast %cst_5 : f32 to vector<8x128xf32>
    %7 = arith.maximumf %5, %6 : vector<8x128xf32>
    %c0_6 = arith.constant 0 : index
    %c0_7 = arith.constant 0 : index
    %8 = vector.load %arg4[%c0_6, %c0_7] : memref<128x128xf32, #tpu.memory_space<vmem>>, vector<128x128xf32>
    %cst_8 = arith.constant dense<0.000000e+00> : vector<8x128xf32>
    %9 = tpu.matmul %7, %8, %cst_8 {dimension_numbers = #tpu.dot_dimension_numbers<[1], [0], [0], [1], [0, 0, 1, 1], [], []>} : vector<8x128xf32>, vector<128x128xf32>, vector<8x128xf32> -> vector<8x128xf32>
    %c0_9 = arith.constant 0 : index
    %c0_10 = arith.constant 0 : index
    %10 = vector.load %arg5[%c0_9, %c0_10] : memref<1x128xf32, #tpu.memory_space<vmem>>, vector<1x128xf32>
    %11 = vector.broadcast %10 : vector<1x128xf32> to vector<8x128xf32>
    %12 = arith.addf %9, %11 : vector<8x128xf32>
    %cst_11 = arith.constant 0.000000e+00 : f32
    %13 = vector.broadcast %cst_11 : f32 to vector<8x128xf32>
    %14 = arith.maximumf %12, %13 : vector<8x128xf32>
    %c0_12 = arith.constant 0 : index
    %c0_13 = arith.constant 0 : index
    %15 = vector.load %arg6[%c0_12, %c0_13] : memref<128x128xf32, #tpu.memory_space<vmem>>, vector<128x128xf32>
    %cst_14 = arith.constant dense<0.000000e+00> : vector<8x128xf32>
    %16 = tpu.matmul %14, %15, %cst_14 {dimension_numbers = #tpu.dot_dimension_numbers<[1], [0], [0], [1], [0, 0, 1, 1], [], []>} : vector<8x128xf32>, vector<128x128xf32>, vector<8x128xf32> -> vector<8x128xf32>
    %c0_15 = arith.constant 0 : index
    %c0_16 = arith.constant 0 : index
    %17 = vector.load %arg7[%c0_15, %c0_16] : memref<1x128xf32, #tpu.memory_space<vmem>>, vector<1x128xf32>
    %18 = vector.broadcast %17 : vector<1x128xf32> to vector<8x128xf32>
    %19 = arith.addf %16, %18 : vector<8x128xf32>
    %c0_17 = arith.constant 0 : index
    %c0_18 = arith.constant 0 : index
    %20 = vector.load %arg8[%c0_17, %c0_18] : memref<8x128xf32, #tpu.memory_space<vmem>>, vector<8x128xf32>
    tpu.vector_store %arg8[%c0_17, %c0_18], %19 {strides = array<i32>} : memref<8x128xf32, #tpu.memory_space<vmem>>, vector<8x128xf32>,
    return
  }
  func.func @transform_0(%arg0: i32) -> (i32, i32) {
    %c0_i32 = arith.constant 0 : i32
    %c0_i32_0 = arith.constant 0 : i32
    return %arg0, %c0_i32 : i32, i32
  }
  func.func @transform_1(%arg0: i32) -> (i32, i32) {
    %c0_i32 = arith.constant 0 : i32
    %c0_i32_0 = arith.constant 0 : i32
    %c0_i32_1 = arith.constant 0 : i32
    return %c0_i32, %c0_i32_0 : i32, i32
  }
  func.func @transform_2(%arg0: i32) -> (i32, i32) {
    %c0_i32 = arith.constant 0 : i32
    %c0_i32_0 = arith.constant 0 : i32
    %c0_i32_1 = arith.constant 0 : i32
    return %c0_i32, %c0_i32_0 : i32, i32
  }
  func.func @transform_3(%arg0: i32) -> (i32, i32) {
    %c0_i32 = arith.constant 0 : i32
    %c0_i32_0 = arith.constant 0 : i32
    %c0_i32_1 = arith.constant 0 : i32
    return %c0_i32, %c0_i32_0 : i32, i32
  }
  func.func @transform_4(%arg0: i32) -> (i32, i32) {
    %c0_i32 = arith.constant 0 : i32
    %c0_i32_0 = arith.constant 0 : i32
    %c0_i32_1 = arith.constant 0 : i32
    return %c0_i32, %c0_i32_0 : i32, i32
  }
  func.func @transform_5(%arg0: i32) -> (i32, i32) {
    %c0_i32 = arith.constant 0 : i32
    %c0_i32_0 = arith.constant 0 : i32
    %c0_i32_1 = arith.constant 0 : i32
    return %c0_i32, %c0_i32_0 : i32, i32
  }
  func.func @transform_6(%arg0: i32) -> (i32, i32) {
    %c0_i32 = arith.constant 0 : i32
    %c0_i32_0 = arith.constant 0 : i32
    %c0_i32_1 = arith.constant 0 : i32
    return %c0_i32, %c0_i32_0 : i32, i32
  }
  func.func @transform_7(%arg0: i32) -> (i32, i32) {
    %c0_i32 = arith.constant 0 : i32
    %c0_i32_0 = arith.constant 0 : i32
    return %arg0, %c0_i32 : i32, i32
  }
}

</mosaic_0001>

<bundles_post_ra>
// kernel: cmlp_forward.1
= control target key start
LH: loop header
LB: loop body
LE: loop exit
PB: predicated region body
PF: predicated region fallthrough
CT: control target
= control target key end

     0   :  { %s848_s24 = smov 0   ;;  %s1003_s0 = inlined_call_operand.vmem [shape: f32[16,12], index: 0, kind: input, shape index: {}]   ;;  %s1004_s1 = inlined_call_operand.vmem [shape: f32[12,128], index: 1, kind: input, shape index: {}]   ;;  %s1005_s2 = inlined_call_operand.vmem [shape: f32[1,128], index: 2, kind: input, shape index: {}]   ;;  %s1006_s3 = inlined_call_operand.vmem [shape: f32[128,128], index: 3, kind: input, shape index: {}]   ;;  %s1007_s4 = inlined_call_operand.vmem [shape: f32[1,128], index: 4, kind: input, shape index: {}]   ;;  %s1008_s5 = inlined_call_operand.vmem [shape: f32[128,128], index: 5, kind: input, shape index: {}]   ;;  %s1009_s6 = inlined_call_operand.vmem [shape: f32[1,128], index: 6, kind: input, shape index: {}]   ;;  %s1010_s7 = inlined_call_operand.vmem [shape: f32[16,128], index: 7, kind: output, shape index: {}]  }
   0x1 LB: > { %s604_s25 = sadd.s32 4294967295, %s802_s24   ;;  %p608_p0 = scmp.ge.s32.totalorder %s802_s24, 1  ;;  %s802_s24 = sphi %s848_s24, %s17_s24  }
   0x2   : > { %p236_p1 = scmp.lt.s32.totalorder %s802_s24, 3 }
   0x4   : > { %p237_p2 = pnand %p608_p0, %p236_p1 }
   0x5   : > { %v274_v0 = vld [vmem:[%s1004_s1] sm:$0xff] (!%p237_p2)  ;;  %v275_v1 = vld [vmem:[%s1004_s1 + $0x8] sm:$0xf] (!%p237_p2)  ;;  %vm288_vm0 = vcmask (!%p237_p2), 1043456   ;;  %v804_v2 = vmov (!%p237_p2), 0.0|0.0   ;;  %vm805_vm1 = vmmov (!%p237_p2), 1  }
   0x6   : > { %240 = sbr.rel (%p237_p2) target bundleno = 664 (0x298), region = 48  ;;  %732 = vmatprep.subr.bf16.mxu0 (!%p237_p2), %v804_v2  ;;  %v733_v3 = vpack.c.bf16 (!%p237_p2), %v275_v1, %v274_v0  ;;  %vm734_vm2 = vmpackc.low (!%p237_p2), %vm288_vm0, %vm805_vm1  ;;  %p266_p3 = scmp.lt.s32.totalorder (!%p237_p2), %s604_s25, 1  ;;  %736 = vmatprep.subr.bf16.mxu1 (!%p237_p2), %v804_v2  ;;  %v363_v4 = vld [vmem:[%s1006_s3] sm:$0xff] (!%p237_p2)  ;;  %v364_v5 = vld [vmem:[%s1006_s3 + $0x8] sm:$0xff] (!%p237_p2)  ;;  %vm806_vm3 = vmmov (!%p237_p2), 0   ;;  %v807_v6 = vmov (!%p237_p2), 0.0  }
   0x7   : > { %659 = vmatprep.mubr.msk.f32.mxu0 (!%p237_p2), %vm806_vm3, %v807_v6  ;;  %v737_v7 = vpack.c.bf16 (!%p237_p2), %v364_v5, %v363_v4  ;;  %v365_v8 = vld [vmem:[%s1006_s3 + $0x10] sm:$0xff] (!%p237_p2)  ;;  %v366_v9 = vld [vmem:[%s1006_s3 + $0x18] sm:$0xff] (!%p237_p2)  ;;  %694 = vmatprep.mubr.msk.f32.mxu1 (!%p237_p2), %vm806_vm3, %v807_v6  ;;  %vm284_vm4 = vcmask (!%p237_p2), 97280   ;;  %v367_v11 = vld [vmem:[%s1006_s3 + $0x20] sm:$0xff] (!%p237_p2) }
   0x8   : > { %735 = vmatpush3.bf16.msk.msra.mxu0 (!%p237_p2), %vm734_vm2, %v733_v3  ;;  %v740_v10 = vpack.c.bf16 (!%p237_p2), %v366_v9, %v365_v8  ;;  %v368_v12 = vld [vmem:[%s1006_s3 + $0x28] sm:$0xff] (!%p237_p2)  ;;  %v369_v15 = vld [vmem:[%s1006_s3 + $0x30] sm:$0xff] (!%p237_p2)  ;;  %v370_v16 = vld [vmem:[%s1006_s3 + $0x38] sm:$0xff] (!%p237_p2) }
   0x9   : > { %738 = vmatpush3.bf16.msra.mxu1 (!%p237_p2), %v737_v7  ;;  %760 = vmatprep.subr.bf16.mxu0 (!%p237_p2), %v804_v2  ;;  %v743_v14 = vpack.c.bf16 (!%p237_p2), %v368_v12, %v367_v11  ;;  %v746_v17 = vpack.c.bf16 (!%p237_p2), %v370_v16, %v369_v15  ;;  %v371_v18 = vld [vmem:[%s1006_s3 + $0x40] sm:$0xff] (!%p237_p2)  ;;  %v372_v19 = vld [vmem:[%s1006_s3 + $0x48] sm:$0xff] (!%p237_p2)  ;;  %v373_v21 = vld [vmem:[%s1006_s3 + $0x50] sm:$0xff] (!%p237_p2) }
   0xa   : > { %739 = vmatprep.subr.bf16.mxu1 (!%p237_p2), %v804_v2  ;;  %v749_v20 = vpack.c.bf16 (!%p237_p2), %v372_v19, %v371_v18  ;;  %v374_v22 = vld [vmem:[%s1006_s3 + $0x58] sm:$0xff] (!%p237_p2)  ;;  %v375_v24 = vld [vmem:[%s1006_s3 + $0x60] sm:$0xff] (!%p237_p2)  ;;  %v376_v25 = vld [vmem:[%s1006_s3 + $0x68] sm:$0xff] (!%p237_p2) }
   0xb   : > { %v752_v23 = vpack.c.bf16 (!%p237_p2), %v374_v22, %v373_v21  ;;  %v755_v26 = vpack.c.bf16 (!%p237_p2), %v376_v25, %v375_v24  ;;  %v377_v27 = vld [vmem:[%s1006_s3 + $0x70] sm:$0xff] (!%p237_p2)  ;;  %v378_v28 = vld [vmem:[%s1006_s3 + $0x78] sm:$0xff] (!%p237_p2)  ;;  %v457_v30 = vld [vmem:[%s1008_s5] sm:$0xff] (!%p237_p2) }
   0xc   : > { %v758_v29 = vpack.c.bf16 (!%p237_p2), %v378_v28, %v377_v27  ;;  %v458_v31 = vld [vmem:[%s1008_s5 + $0x8] sm:$0xff] (!%p237_p2)  ;;  %v459_v32 = vld [vmem:[%s1008_s5 + $0x10] sm:$0xff] (!%p237_p2)  ;;  %v460_v34 = vld [vmem:[%s1008_s5 + $0x18] sm:$0xff] (!%p237_p2) }
   0xd   : > { %s1012_s25 = smov (!%p266_p3, %s604_s25), 1  ;;  %741 = vmatpush3.bf16.msra.mxu1 %v740_v10  ;;  %v761_v33 = vpack.c.bf16 %v458_v31, %v457_v30  ;;  %v764_v35 = vpack.c.bf16 %v460_v34, %v459_v32  ;;  %v461_v36 = vld [vmem:[%s1008_s5 + $0x20] sm:$0xff]  ;;  %v462_v37 = vld [vmem:[%s1008_s5 + $0x28] sm:$0xff]  ;;  %v463_v39 = vld [vmem:[%s1008_s5 + $0x30] sm:$0xff] }
   0xe   : > { %s609_s15 = sshll.u32 %s1012_s25, 3  ;;  %742 = vmatprep.subr.bf16.mxu1 %v804_v2  ;;  %v767_v38 = vpack.c.bf16 %v462_v37, %v461_v36  ;;  %v464_v40 = vld [vmem:[%s1008_s5 + $0x38] sm:$0xff]  ;;  %v465_v42 = vld [vmem:[%s1008_s5 + $0x40] sm:$0xff]  ;;  %v466_v43 = vld [vmem:[%s1008_s5 + $0x48] sm:$0xff] }
   0xf   : > { %s269_s22 = scalar_lea.vmem %s1003_s0, %s609_s15  ;;  %v770_v41 = vpack.c.bf16 %v464_v40, %v463_v39  ;;  %v773_v44 = vpack.c.bf16 %v466_v43, %v465_v42  ;;  %v467_v45 = vld [vmem:[%s1008_s5 + $0x50] sm:$0xff]  ;;  %v468_v46 = vld [vmem:[%s1008_s5 + $0x58] sm:$0xff]  ;;  %v469_v48 = vld [vmem:[%s1008_s5 + $0x60] sm:$0xff]  ;;  %s273_s23 = scalar_lea.vmem %s1010_s7, %s609_s15 }
  0x10   : > { %v276_v13 = vld [vmem:[%s269_s22] sm:$0xff]  ;;  %v776_v47 = vpack.c.bf16 %v468_v46, %v467_v45  ;;  %v470_v49 = vld [vmem:[%s1008_s5 + $0x68] sm:$0xff]  ;;  %v471_v56 = vld [vmem:[%s1008_s5 + $0x70] sm:$0xff] }
  0x11   : > { %660 = vmatmul.mubr.msk.f32.vlgmr.msra.gmra.mrb[0].mxu0 %vm284_vm4, %v276_v13  ;;  %744 = vmatpush3.bf16.msra.mxu1 %v743_v14  ;;  %v779_v50 = vpack.c.bf16 %v470_v49, %v469_v48  ;;  %v611_v51 = vld [vmem:[%s1005_s2] ss:$0 sm:$0xff]  ;;  %v472_v57 = vld [vmem:[%s1008_s5 + $0x78] sm:$0xff] }
  0x12   : > { %729 = vmatprep.mubr.msk.f32.mxu0 %vm806_vm3, %v807_v6  ;;  %745 = vmatprep.subr.bf16.mxu1 %v804_v2  ;;  %v782_v58 = vpack.c.bf16 %v472_v57, %v471_v56  ;;  %v614_v59 = vld [vmem:[%s1007_s4] ss:$0 sm:$0xff] }
  0x13   : > { %762 = vmatpush3.bf16.msra.mxu0 %v761_v33  ;;  %v615_v0 = vld [vmem:[%s1009_s6] ss:$0 sm:$0xff] }
  0x14   : > { %763 = vmatprep.subr.bf16.mxu0 %v804_v2 }
  0x15   : > { %747 = vmatpush3.bf16.msra.mxu1 %v746_v17 }
  0x16   : > { %748 = vmatprep.subr.bf16.mxu1 %v804_v2 }
  0x17   : > { %765 = vmatpush3.bf16.msra.mxu0 %v764_v35 }
  0x18   : > { %766 = vmatprep.subr.bf16.mxu0 %v804_v2 }
  0x19   : > { %750 = vmatpush3.bf16.msra.mxu1 %v749_v20 }
  0x1a   : > { %751 = vmatprep.subr.bf16.mxu1 %v804_v2 }
  0x1b   : > { %768 = vmatpush3.bf16.msra.mxu0 %v767_v38 }
  0x1c   : > { %769 = vmatprep.subr.bf16.mxu0 %v804_v2 }
  0x1d   : > { %753 = vmatpush3.bf16.msra.mxu1 %v752_v23 }
  0x1e   : > { %754 = vmatprep.subr.bf16.mxu1 %v804_v2 }
  0x1f   : > { %771 = vmatpush3.bf16.msra.mxu0 %v770_v41 }
  0x20   : > { %772 = vmatprep.subr.bf16.mxu0 %v804_v2 }
  0x21   : > { %756 = vmatpush3.bf16.msra.mxu1 %v755_v26 }
  0x22   : > { %757 = vmatprep.subr.bf16.mxu1 %v804_v2 }
  0x23   : > { %774 = vmatpush3.bf16.msra.mxu0 %v773_v44 }
  0x24   : > { %775 = vmatprep.subr.bf16.mxu0 %v804_v2 }
  0x25   : > { %759 = vmatpush3.bf16.msra.mxu1 %v758_v29 }
  0x27   : > { %777 = vmatpush3.bf16.msra.mxu0 %v776_v47 }
  0x28   : > { %778 = vmatprep.subr.bf16.mxu0 %v804_v2 }
  0x2b   : > { %780 = vmatpush3.bf16.msra.mxu0 %v779_v50 }
  0x2c   : > { %781 = vmatprep.subr.bf16.mxu0 %v804_v2 }
  0x2f   : > { %783 = vmatpush3.bf16.msra.mxu0 %v782_v58 }
  0xe4   : > { %v358_v52 = vpop.f32.mrb[0].mxu0 }
  0xe5   : > { %v359_v53 = vadd.f32 %v611_v51, %v358_v52  ;;  %v661_v54 = vpop.f32.mrb[1].mxu0 }
  0xe7   : > { %v362_v55 = vmax.f32 %v359_v53, 0.0 }
  0xe9   : > { %695 = vmatmul.mubr.f32.vlgmr.msra.gmra.mrb[0].mxu1 %v362_v55 }
 0x1bc   : > { %v452_v60 = vpop.f32.mrb[0].mxu1 }
 0x1bd   : > { %v453_v61 = vadd.f32 %v614_v59, %v452_v60  ;;  %v696_v62 = vpop.f32.mrb[1].mxu1 }
 0x1bf   : > { %v456_v63 = vmax.f32 %v453_v61, 0.0 }
 0x1c1   : > { %730 = vmatmul.mubr.f32.vlgmr.msra.gmra.mrb[2].mxu0 %v456_v63 }
 0x294   : > { %v546_v1 = vpop.f32.mrb[2].mxu0 }
 0x295   : > { %v547_v2 = vadd.f32 %v615_v0, %v546_v1  ;;  %v731_v3 = vpop.f32.mrb[3].mxu0 }
 0x297   : > { %550 = vst [vmem:[%s273_s23] sm:$0xff] %v547_v2 }
 0x298 PF: > { %s17_s24 = sadd.s32 1, %s802_s24  }
 0x299   : > { %p14_p4 = scmp.ge.s32.totalorder %s17_s24, 4  }
 0x29b   :  { %16 = sbr.rel (!%p14_p4) target bundleno = 1 (0x1), region = 78 }

</bundles_post_ra>
